<compile_context>
chip_gen: v7x
topology: tpu7x:2x2x1
jax: 0.10.0
libtpu: 0.0.40
codegen_flags: <defaults>
</compile_context>

<pallas_src>
import math
import functools

import jax
import jax.numpy as jnp
from jax.experimental import pallas as pl
from jax.experimental.pallas import tpu as pltpu


def _ceil_to(x, m):
    return ((x + m - 1) // m) * m


def _vmem_capacity_bytes():
    try:
        return int(pltpu.get_tpu_info().vmem_capacity_bytes)
    except Exception:
        return 64 << 20  # conservative fallback (v7x per-TensorCore VMEM)


def _vmem_estimate(tm, dp, out_itemsize):
    """Rough VMEM footprint for one pipelined step."""
    xin = 2 * tm * dp * 2            # bf16 input block, double buffered
    out = 2 * tm * dp * out_itemsize  # output block, double buffered
    tmp = 4 * tm * dp * 4            # in-kernel f32 temporaries
    consts = dp * dp * 2 + 3 * dp * 4  # bf16 weight + f32 vectors (single buf)
    return xin + out + tmp + consts


def _pick_block_m(m, dp, out_itemsize, budget):
    """Largest row tile fitting the VMEM budget; 256-aligned tiles first
    (v6e/v7x MXU), then 128 (v5e), then down to 8."""
    tm = 8
    for cand in (2048, 1024, 512, 256, 128, 64, 32, 16, 8):
        if cand > max(m, 8):
            continue
        if _vmem_estimate(cand, dp, out_itemsize) <= budget:
            tm = cand
            break
    # Keep >= 2 grid steps so the parallel axis can shard across the two
    # TensorCores on v7x (one extra ~0.35us step is noise on v5e/v6e).
    while tm > 8 and -(-m // tm) < 2:
        tm //= 2
    return max(tm, 8)


def head_transform_kernel(x_ref, w_ref, b_ref, lnw_ref, lnb_ref, o_ref, *,
                          eps, inv_d):
    # x_ref: (TM, Dp) bf16 | w_ref: (Dp, Dp) bf16 | b/lnw/lnb: (1, Dp) f32
    # Dense on the MXU: bf16 operands, f32 accumulation.
    y = jnp.dot(x_ref[...], w_ref[...],
                preferred_element_type=jnp.float32) + b_ref[...]

    # Exact erf-based gelu (matches the PyTorch reference), in f32.
    y = y * 0.5 * (1.0 + jax.lax.erf(y * (1.0 / math.sqrt(2.0))))

    # TF-style LayerNorm, one pass: var = E[y^2] - mean^2.  Padded lanes of y
    # are exactly zero, so sums over the padded width equal sums over the real
    # hidden size; inv_d = 1/D (real D, not padded).
    sum_y = jnp.sum(y, axis=-1, keepdims=True)
    sum_yy = jnp.sum(y * y, axis=-1, keepdims=True)
    u = sum_y * inv_d
    var = jnp.maximum(sum_yy * inv_d - u * u, 0.0)
    yn = (y - u) * jax.lax.rsqrt(var + eps)
    o_ref[...] = (lnw_ref[...] * yn + lnb_ref[...]).astype(o_ref.dtype)


def bert_prediction_head_transform(hidden_states, params, *, eps=1e-12,
                                   out_dtype=jnp.float32):
    """hidden_states: (..., D); params: w (D,D) [in,out], b/ln_w/ln_b (1,D)."""
    orig_shape = hidden_states.shape
    D = orig_shape[-1]
    M = math.prod(orig_shape[:-1])

    # Lane-dense hidden dim (multiple of 128); zero padding keeps the matmul,
    # gelu and LayerNorm sums exact (padded output lanes stay exactly 0).
    Dp = max(128, _ceil_to(D, 128))

    out_itemsize = jnp.dtype(out_dtype).itemsize
    capacity = _vmem_capacity_bytes()
    budget = int(0.75 * capacity)                 # ~25% headroom
    tm = _pick_block_m(M, Dp, out_itemsize, budget)
    grid_m = -(-M // tm)
    Mp = grid_m * tm

    # Activations go in as bf16 (the MXU consumes bf16 anyway).
    x2 = hidden_states.reshape(M, D).astype(jnp.bfloat16)
    x2 = jnp.pad(x2, ((0, Mp - M), (0, Dp - D)))

    w = jnp.pad(params["w"].astype(jnp.bfloat16), ((0, Dp - D), (0, Dp - D)))

    def padvec(v):
        return jnp.pad(v.reshape(1, D).astype(jnp.float32),
                       ((0, 0), (0, Dp - D)))

    b = padvec(params["b"])
    ln_w = padvec(params["ln_w"])
    ln_b = padvec(params["ln_b"])

    est = _vmem_estimate(tm, Dp, out_itemsize)
    vmem_limit = int(min(budget, max(2 * est, 16 << 20)))

    kernel = functools.partial(head_transform_kernel, eps=eps, inv_d=1.0 / D)

    def run(single_buffer_consts):
        if single_buffer_consts:
            def const2d(shape):
                return pl.BlockSpec(shape, lambda i: (0, 0),
                                    pipeline_mode=pl.Buffered(1))
        else:
            def const2d(shape):
                return pl.BlockSpec(shape, lambda i: (0, 0))
        return pl.pallas_call(
            kernel,
            out_shape=jax.ShapeDtypeStruct((Mp, Dp), out_dtype),
            grid=(grid_m,),
            in_specs=[
                pl.BlockSpec((tm, Dp), lambda i: (i, 0)),  # activations
                const2d((Dp, Dp)),                          # W  (bf16)
                const2d((1, Dp)),                           # b
                const2d((1, Dp)),                           # ln_w
                const2d((1, Dp)),                           # ln_b
            ],
            out_specs=pl.BlockSpec((tm, Dp), lambda i: (i, 0)),
            compiler_params=pltpu.CompilerParams(
                dimension_semantics=("parallel",),
                vmem_limit_bytes=vmem_limit),
        )(x2, w, b, ln_w, ln_b)

    try:
        out = run(True)    # single-buffered grid-invariant operands
    except Exception:
        out = run(False)   # safe fallback: default double buffering

    return out[:M, :D].reshape(orig_shape)


def head_transform_ref(x, params, *, eps=1e-12, matmul_dtype=jnp.float32):
    """Plain-JAX reference matching the PyTorch forward.

    matmul_dtype=bfloat16 mirrors the kernel's MXU operand cast;
    matmul_dtype=float32 is the exact PyTorch-f32 semantics.
    """
    D = x.shape[-1]
    y = jnp.dot(x.astype(matmul_dtype), params["w"].astype(matmul_dtype),
                preferred_element_type=jnp.float32) + params["b"].reshape(1, D)
    y = y * 0.5 * (1.0 + jax.lax.erf(y / math.sqrt(2.0)))
    u = y.mean(-1, keepdims=True)
    s = ((y - u) ** 2).mean(-1, keepdims=True)
    yn = (y - u) / jnp.sqrt(s + eps)
    return params["ln_w"].reshape(1, D) * yn + params["ln_b"].reshape(1, D)


if __name__ == "__main__":
    # Small config consistent with the module: batch=2, seq=8, hidden=32.
    N, L, D = 2, 8, 32

    key = jax.random.PRNGKey(0)
    k = jax.random.split(key, 5)

    params = {
        "w":    (0.1 * jax.random.normal(k[0], (D, D))).astype(jnp.float32),
        "b":    (0.02 * jax.random.normal(k[1], (1, D))).astype(jnp.float32),
        "ln_w": (1.0 + 0.1 * jax.random.normal(k[2], (1, D))).astype(jnp.float32),
        "ln_b": (0.1 * jax.random.normal(k[3], (1, D))).astype(jnp.float32),
    }
    x = jax.random.normal(k[4], (N, L, D), dtype=jnp.float32)

    out = jax.block_until_ready(bert_prediction_head_transform(x, params))
    assert out.shape == (N, L, D)
    assert out.dtype == jnp.float32

    # Tight check vs a reference that mirrors the kernel's bf16 matmul cast.
    ref_bf16 = head_transform_ref(x, params, matmul_dtype=jnp.bfloat16)
    assert jnp.allclose(out, ref_bf16, atol=3e-4, rtol=3e-4), \
        "mismatch vs bf16-matmul JAX reference"

    # Looser sanity check vs the exact f32 PyTorch-equivalent semantics
    # (difference is only the bf16 operand cast on the dense matmul).
    ref_f32 = head_transform_ref(x, params, matmul_dtype=jnp.float32)
    assert jnp.allclose(out, ref_f32, atol=5e-2, rtol=5e-2), \
        "mismatch vs f32 JAX reference"

    print("KERNEL_OK")
</pallas_src>

<mosaic_0001>
module attributes {stable_mosaic.version = 11 : i64} {
  func.func @head_transform_kernel(%arg0: i32, %arg1: memref<8x128xbf16, #tpu.memory_space<vmem>>, %arg2: memref<128x128xbf16, #tpu.memory_space<vmem>>, %arg3: memref<1x128xf32, #tpu.memory_space<vmem>>, %arg4: memref<1x128xf32, #tpu.memory_space<vmem>>, %arg5: memref<1x128xf32, #tpu.memory_space<vmem>>, %arg6: memref<8x128xf32, #tpu.memory_space<vmem>>) attributes {dimension_semantics = [#tpu.dimension_semantics<parallel>], iteration_bounds = array<i64: 2>, scalar_prefetch = 0 : i64, scratch_operands = 0 : i64, tpu.core_type = #tpu.core_type<tc>, window_params = [{transform_indices = @transform_0, window_bounds = array<i64: 8, 128>}, {pipeline_mode = #tpu.pipeline_mode<synchronous>, transform_indices = @transform_1, window_bounds = array<i64: 128, 128>}, {pipeline_mode = #tpu.pipeline_mode<synchronous>, transform_indices = @transform_2, window_bounds = array<i64: 1, 128>}, {pipeline_mode = #tpu.pipeline_mode<synchronous>, transform_indices = @transform_3, window_bounds = array<i64: 1, 128>}, {pipeline_mode = #tpu.pipeline_mode<synchronous>, transform_indices = @transform_4, window_bounds = array<i64: 1, 128>}, {transform_indices = @transform_5, window_bounds = array<i64: 8, 128>}]} {
    %c0 = arith.constant 0 : index
    %c0_0 = arith.constant 0 : index
    %0 = vector.load %arg1[%c0, %c0_0] : memref<8x128xbf16, #tpu.memory_space<vmem>>, vector<8x128xbf16>
    %c0_1 = arith.constant 0 : index
    %c0_2 = arith.constant 0 : index
    %1 = vector.load %arg2[%c0_1, %c0_2] : memref<128x128xbf16, #tpu.memory_space<vmem>>, vector<128x128xbf16>
    %cst = arith.constant dense<0.000000e+00> : vector<8x128xf32>
    %2 = tpu.matmul %0, %1, %cst {dimension_numbers = #tpu.dot_dimension_numbers<[1], [0], [0], [1], [0, 0, 1, 1], [], []>} : vector<8x128xbf16>, vector<128x128xbf16>, vector<8x128xf32> -> vector<8x128xf32>
    %c0_3 = arith.constant 0 : index
    %c0_4 = arith.constant 0 : index
    %3 = vector.load %arg3[%c0_3, %c0_4] : memref<1x128xf32, #tpu.memory_space<vmem>>, vector<1x128xf32>
    %4 = vector.broadcast %3 : vector<1x128xf32> to vector<8x128xf32>
    %5 = arith.addf %2, %4 : vector<8x128xf32>
    %cst_5 = arith.constant 5.000000e-01 : f32
    %6 = vector.broadcast %cst_5 : f32 to vector<8x128xf32>
    %7 = arith.mulf %5, %6 : vector<8x128xf32>
    %cst_6 = arith.constant 0.707106769 : f32
    %8 = vector.broadcast %cst_6 : f32 to vector<8x128xf32>
    %9 = arith.mulf %5, %8 : vector<8x128xf32>
    %10 = math.erf %9 : vector<8x128xf32>
    %cst_7 = arith.constant 1.000000e+00 : f32
    %11 = vector.broadcast %cst_7 : f32 to vector<8x128xf32>
    %12 = arith.addf %11, %10 : vector<8x128xf32>
    %13 = arith.mulf %7, %12 : vector<8x128xf32>
    %cst_8 = arith.constant dense<0.000000e+00> : vector<8xf32>
    %14 = vector.multi_reduction <add>, %13, %cst_8 [1] : vector<8x128xf32> to vector<8xf32>
    %15 = vector.shape_cast %14 : vector<8xf32> to vector<8x1xf32>
    %16 = arith.mulf %13, %13 : vector<8x128xf32>
    %cst_9 = arith.constant dense<0.000000e+00> : vector<8xf32>
    %17 = vector.multi_reduction <add>, %16, %cst_9 [1] : vector<8x128xf32> to vector<8xf32>
    %18 = vector.shape_cast %17 : vector<8xf32> to vector<8x1xf32>
    %cst_10 = arith.constant 3.125000e-02 : f32
    %19 = vector.broadcast %cst_10 : f32 to vector<8x1xf32>
    %20 = arith.mulf %15, %19 : vector<8x1xf32>
    %cst_11 = arith.constant 3.125000e-02 : f32
    %21 = vector.broadcast %cst_11 : f32 to vector<8x1xf32>
    %22 = arith.mulf %18, %21 : vector<8x1xf32>
    %23 = arith.mulf %20, %20 : vector<8x1xf32>
    %24 = arith.subf %22, %23 : vector<8x1xf32>
    %cst_12 = arith.constant 0.000000e+00 : f32
    %25 = vector.broadcast %cst_12 : f32 to vector<8x1xf32>
    %26 = arith.maximumf %24, %25 : vector<8x1xf32>
    %27 = vector.broadcast %20 : vector<8x1xf32> to vector<8x128xf32>
    %28 = arith.subf %13, %27 : vector<8x128xf32>
    %cst_13 = arith.constant 9.99999996E-13 : f32
    %29 = vector.broadcast %cst_13 : f32 to vector<8x1xf32>
    %30 = arith.addf %26, %29 : vector<8x1xf32>
    %31 = math.rsqrt %30 : vector<8x1xf32>
    %32 = vector.broadcast %31 : vector<8x1xf32> to vector<8x128xf32>
    %33 = arith.mulf %28, %32 : vector<8x128xf32>
    %c0_14 = arith.constant 0 : index
    %c0_15 = arith.constant 0 : index
    %34 = vector.load %arg4[%c0_14, %c0_15] : memref<1x128xf32, #tpu.memory_space<vmem>>, vector<1x128xf32>
    %35 = vector.broadcast %34 : vector<1x128xf32> to vector<8x128xf32>
    %36 = arith.mulf %35, %33 : vector<8x128xf32>
    %c0_16 = arith.constant 0 : index
    %c0_17 = arith.constant 0 : index
    %37 = vector.load %arg5[%c0_16, %c0_17] : memref<1x128xf32, #tpu.memory_space<vmem>>, vector<1x128xf32>
    %38 = vector.broadcast %37 : vector<1x128xf32> to vector<8x128xf32>
    %39 = arith.addf %36, %38 : vector<8x128xf32>
    %c0_18 = arith.constant 0 : index
    %c0_19 = arith.constant 0 : index
    %40 = vector.load %arg6[%c0_18, %c0_19] : memref<8x128xf32, #tpu.memory_space<vmem>>, vector<8x128xf32>
    tpu.vector_store %arg6[%c0_18, %c0_19], %39 {strides = array<i32>} : memref<8x128xf32, #tpu.memory_space<vmem>>, vector<8x128xf32>,
    return
  }
  func.func @transform_0(%arg0: i32) -> (i32, i32) {
    %c0_i32 = arith.constant 0 : i32
    %c0_i32_0 = arith.constant 0 : i32
    return %arg0, %c0_i32 : i32, i32
  }
  func.func @transform_1(%arg0: i32) -> (i32, i32) {
    %c0_i32 = arith.constant 0 : i32
    %c0_i32_0 = arith.constant 0 : i32
    %c0_i32_1 = arith.constant 0 : i32
    return %c0_i32, %c0_i32_0 : i32, i32
  }
  func.func @transform_2(%arg0: i32) -> (i32, i32) {
    %c0_i32 = arith.constant 0 : i32
    %c0_i32_0 = arith.constant 0 : i32
    %c0_i32_1 = arith.constant 0 : i32
    return %c0_i32, %c0_i32_0 : i32, i32
  }
  func.func @transform_3(%arg0: i32) -> (i32, i32) {
    %c0_i32 = arith.constant 0 : i32
    %c0_i32_0 = arith.constant 0 : i32
    %c0_i32_1 = arith.constant 0 : i32
    return %c0_i32, %c0_i32_0 : i32, i32
  }
  func.func @transform_4(%arg0: i32) -> (i32, i32) {
    %c0_i32 = arith.constant 0 : i32
    %c0_i32_0 = arith.constant 0 : i32
    %c0_i32_1 = arith.constant 0 : i32
    return %c0_i32, %c0_i32_0 : i32, i32
  }
  func.func @transform_5(%arg0: i32) -> (i32, i32) {
    %c0_i32 = arith.constant 0 : i32
    %c0_i32_0 = arith.constant 0 : i32
    return %arg0, %c0_i32 : i32, i32
  }
}

module attributes {stable_mosaic.version = 11 : i64} {
  func.func @head_transform_kernel(%arg0: i32, %arg1: memref<8x128xbf16, #tpu.memory_space<vmem>>, %arg2: memref<128x128xbf16, #tpu.memory_space<vmem>>, %arg3: memref<1x128xf32, #tpu.memory_space<vmem>>, %arg4: memref<1x128xf32, #tpu.memory_space<vmem>>, %arg5: memref<1x128xf32, #tpu.memory_space<vmem>>, %arg6: memref<8x128xf32, #tpu.memory_space<vmem>>) attributes {dimension_semantics = [#tpu.dimension_semantics<parallel>], iteration_bounds = array<i64: 2>, scalar_prefetch = 0 : i64, scratch_operands = 0 : i64, tpu.core_type = #tpu.core_type<tc>, window_params = [{transform_indices = @transform_0, window_bounds = array<i64: 8, 128>}, {pipeline_mode = #tpu.pipeline_mode<synchronous>, transform_indices = @transform_1, window_bounds = array<i64: 128, 128>}, {pipeline_mode = #tpu.pipeline_mode<synchronous>, transform_indices = @transform_2, window_bounds = array<i64: 1, 128>}, {pipeline_mode = #tpu.pipeline_mode<synchronous>, transform_indices = @transform_3, window_bounds = array<i64: 1, 128>}, {pipeline_mode = #tpu.pipeline_mode<synchronous>, transform_indices = @transform_4, window_bounds = array<i64: 1, 128>}, {transform_indices = @transform_5, window_bounds = array<i64: 8, 128>}]} {
    %c0 = arith.constant 0 : index
    %c0_0 = arith.constant 0 : index
    %0 = vector.load %arg1[%c0, %c0_0] : memref<8x128xbf16, #tpu.memory_space<vmem>>, vector<8x128xbf16>
    %c0_1 = arith.constant 0 : index
    %c0_2 = arith.constant 0 : index
    %1 = vector.load %arg2[%c0_1, %c0_2] : memref<128x128xbf16, #tpu.memory_space<vmem>>, vector<128x128xbf16>
    %cst = arith.constant dense<0.000000e+00> : vector<8x128xf32>
    %2 = tpu.matmul %0, %1, %cst {dimension_numbers = #tpu.dot_dimension_numbers<[1], [0], [0], [1], [0, 0, 1, 1], [], []>} : vector<8x128xbf16>, vector<128x128xbf16>, vector<8x128xf32> -> vector<8x128xf32>
    %c0_3 = arith.constant 0 : index
    %c0_4 = arith.constant 0 : index
    %3 = vector.load %arg3[%c0_3, %c0_4] : memref<1x128xf32, #tpu.memory_space<vmem>>, vector<1x128xf32>
    %4 = vector.broadcast %3 : vector<1x128xf32> to vector<8x128xf32>
    %5 = arith.addf %2, %4 : vector<8x128xf32>
    %cst_5 = arith.constant 5.000000e-01 : f32
    %6 = vector.broadcast %cst_5 : f32 to vector<8x128xf32>
    %7 = arith.mulf %5, %6 : vector<8x128xf32>
    %cst_6 = arith.constant 0.707106769 : f32
    %8 = vector.broadcast %cst_6 : f32 to vector<8x128xf32>
    %9 = arith.mulf %5, %8 : vector<8x128xf32>
    %10 = math.erf %9 : vector<8x128xf32>
    %cst_7 = arith.constant 1.000000e+00 : f32
    %11 = vector.broadcast %cst_7 : f32 to vector<8x128xf32>
    %12 = arith.addf %11, %10 : vector<8x128xf32>
    %13 = arith.mulf %7, %12 : vector<8x128xf32>
    %cst_8 = arith.constant dense<0.000000e+00> : vector<8xf32>
    %14 = vector.multi_reduction <add>, %13, %cst_8 [1] : vector<8x128xf32> to vector<8xf32>
    %15 = vector.shape_cast %14 : vector<8xf32> to vector<8x1xf32>
    %16 = arith.mulf %13, %13 : vector<8x128xf32>
    %cst_9 = arith.constant dense<0.000000e+00> : vector<8xf32>
    %17 = vector.multi_reduction <add>, %16, %cst_9 [1] : vector<8x128xf32> to vector<8xf32>
    %18 = vector.shape_cast %17 : vector<8xf32> to vector<8x1xf32>
    %cst_10 = arith.constant 3.125000e-02 : f32
    %19 = vector.broadcast %cst_10 : f32 to vector<8x1xf32>
    %20 = arith.mulf %15, %19 : vector<8x1xf32>
    %cst_11 = arith.constant 3.125000e-02 : f32
    %21 = vector.broadcast %cst_11 : f32 to vector<8x1xf32>
    %22 = arith.mulf %18, %21 : vector<8x1xf32>
    %23 = arith.mulf %20, %20 : vector<8x1xf32>
    %24 = arith.subf %22, %23 : vector<8x1xf32>
    %cst_12 = arith.constant 0.000000e+00 : f32
    %25 = vector.broadcast %cst_12 : f32 to vector<8x1xf32>
    %26 = arith.maximumf %24, %25 : vector<8x1xf32>
    %27 = vector.broadcast %20 : vector<8x1xf32> to vector<8x128xf32>
    %28 = arith.subf %13, %27 : vector<8x128xf32>
    %cst_13 = arith.constant 9.99999996E-13 : f32
    %29 = vector.broadcast %cst_13 : f32 to vector<8x1xf32>
    %30 = arith.addf %26, %29 : vector<8x1xf32>
    %31 = math.rsqrt %30 : vector<8x1xf32>
    %32 = vector.broadcast %31 : vector<8x1xf32> to vector<8x128xf32>
    %33 = arith.mulf %28, %32 : vector<8x128xf32>
    %c0_14 = arith.constant 0 : index
    %c0_15 = arith.constant 0 : index
    %34 = vector.load %arg4[%c0_14, %c0_15] : memref<1x128xf32, #tpu.memory_space<vmem>>, vector<1x128xf32>
    %35 = vector.broadcast %34 : vector<1x128xf32> to vector<8x128xf32>
    %36 = arith.mulf %35, %33 : vector<8x128xf32>
    %c0_16 = arith.constant 0 : index
    %c0_17 = arith.constant 0 : index
    %37 = vector.load %arg5[%c0_16, %c0_17] : memref<1x128xf32, #tpu.memory_space<vmem>>, vector<1x128xf32>
    %38 = vector.broadcast %37 : vector<1x128xf32> to vector<8x128xf32>
    %39 = arith.addf %36, %38 : vector<8x128xf32>
    %c0_18 = arith.constant 0 : index
    %c0_19 = arith.constant 0 : index
    %40 = vector.load %arg6[%c0_18, %c0_19] : memref<8x128xf32, #tpu.memory_space<vmem>>, vector<8x128xf32>
    tpu.vector_store %arg6[%c0_18, %c0_19], %39 {strides = array<i32>} : memref<8x128xf32, #tpu.memory_space<vmem>>, vector<8x128xf32>,
    return
  }
  func.func @transform_0(%arg0: i32) -> (i32, i32) {
    %c0_i32 = arith.constant 0 : i32
    %c0_i32_0 = arith.constant 0 : i32
    return %arg0, %c0_i32 : i32, i32
  }
  func.func @transform_1(%arg0: i32) -> (i32, i32) {
    %c0_i32 = arith.constant 0 : i32
    %c0_i32_0 = arith.constant 0 : i32
    %c0_i32_1 = arith.constant 0 : i32
    return %c0_i32, %c0_i32_0 : i32, i32
  }
  func.func @transform_2(%arg0: i32) -> (i32, i32) {
    %c0_i32 = arith.constant 0 : i32
    %c0_i32_0 = arith.constant 0 : i32
    %c0_i32_1 = arith.constant 0 : i32
    return %c0_i32, %c0_i32_0 : i32, i32
  }
  func.func @transform_3(%arg0: i32) -> (i32, i32) {
    %c0_i32 = arith.constant 0 : i32
    %c0_i32_0 = arith.constant 0 : i32
    %c0_i32_1 = arith.constant 0 : i32
    return %c0_i32, %c0_i32_0 : i32, i32
  }
  func.func @transform_4(%arg0: i32) -> (i32, i32) {
    %c0_i32 = arith.constant 0 : i32
    %c0_i32_0 = arith.constant 0 : i32
    %c0_i32_1 = arith.constant 0 : i32
    return %c0_i32, %c0_i32_0 : i32, i32
  }
  func.func @transform_5(%arg0: i32) -> (i32, i32) {
    %c0_i32 = arith.constant 0 : i32
    %c0_i32_0 = arith.constant 0 : i32
    return %arg0, %c0_i32 : i32, i32
  }
}

</mosaic_0001>

<bundles_post_ra>
// kernel: tpu_custom_call.1
= control target key start
LH: loop header
LB: loop body
LE: loop exit
PB: predicated region body
PF: predicated region fallthrough
CT: control target
= control target key end

     0   :  { %10 = vsyncpa [#allocation3], 0  ;;  %s1001_s0 = inlined_call_operand.hbm [shape: bf16[16,128], index: 0, kind: input, shape index: {}]   ;;  %s1002_s1 = inlined_call_operand.hbm [shape: bf16[128,128], index: 1, kind: input, shape index: {}]   ;;  %s1003_s2 = inlined_call_operand.vmem [shape: f32[1,128], index: 2, kind: input, shape index: {}]   ;;  %s1004_s3 = inlined_call_operand.vmem [shape: f32[1,128], index: 3, kind: input, shape index: {}]   ;;  %s1005_s4 = inlined_call_operand.vmem [shape: f32[1,128], index: 4, kind: input, shape index: {}]   ;;  %s1006_s5 = inlined_call_operand.hbm [shape: f32[16,128], index: 5, kind: output, shape index: {}]  }
   0x1   :  { %12 = vsyncpa [#allocation3 + $0x1], 0 }
   0x2   :  { %13 = vsyncpa [#allocation6], 0 }
   0x3   :  { %14 = vsyncpa [#allocation4], 0 }
   0x4   :  { %16 = vsyncpa [#allocation4 + $0x1], 0  ;;  %s792_s18 = smov 0   ;;  %s794_s19 = smov 0  }
   0x5   :  { %s796_s20 = smov 0   ;;  %s798_s21 = smov 0  }
   0x6 LB: > { %s813_s22 = sadd.s32 4294967295, %s753_s21   ;;  %s498_s23 = sadd.s32 4294967294, %s753_s21   ;;  %s753_s21 = sphi %s798_s21, %s1026_s21   ;;  %s749_s20 = sphi %s796_s20, %s1025_s20   ;;  %s745_s19 = sphi %s794_s19, %s1024_s19   ;;  %s741_s18 = sphi %s792_s18, %s1023_s18  }
   0x7   : > { %p42_p0 = scmp.ne.s32.totalorder %s745_s19, %s741_s18  ;;  %p1007_p1 = scmp.eq.s32.totalorder %s813_s22, 0 }
   0x8   : > { %p156_p3 = scmp.eq.s32.totalorder %s498_s23, 1  ;;  %p499_p5 = scmp.ge.s32.totalorder %s753_s21, 1 }
   0x9   : > { %p822_p4 = por %p1007_p1, %p42_p0  ;;  %p163_p7 = scmp.lt.s32.totalorder %s753_s21, 3 }
   0xa   : > { %p827_p6 = por %p156_p3, %p42_p0  ;;  %s755_s27 = smov [#allocation5]  }
   0xb   : > { %s1010_s24 = scalar_select %p822_p4, 1, 0 }
   0xc   : > { %s1011_s25 = scalar_select %p827_p6, 1, 0 }
   0xd   : > { %p832_p8 = pnand %p499_p5, %p163_p7  ;;  %s175_s28 = sshll.u32 %s755_s27, 4  ;;  %s836_s28 = int_to_ptr.vmem [resolvable:$true] %s175_s28 }
   0xe   : > { %s848_s30 = sadd.s32 1, %s753_s21   ;;  %s29_s6 = sadd.s32 1, %s749_s20 }
   0xf   : > { %s1012_s26 = scalar_select %p832_p8, 1, 0 }
  0x10   : > { %p560_p9 = pneg %p832_p8  ;;  %s26_s7 = ssub.s32 %s753_s21, %s848_s30 }
  0x11   : > { %s625_s10 = scalar_lea.hbm %s1002_s1, 1024 }
  0x12   : > { %p843_p11 = pnand %p560_p9, %p1007_p1  ;;  %p626_p12 = scmp.ne.s32.totalorder %s1002_s1, %s625_s10 }
  0x13   : > { %p632_p5 = scmp.lt.u32.totalorder %s625_s10, %s1002_s1 }
  0x14   : > { %p627_p13 = pneg %p843_p11 }
  0x16   : > { %p628_p0 = pnand %p627_p13, %p626_p12 }
  0x18   : > { %p629_p3 = pneg %p628_p0 }
  0x1a   : > { %p634_p7 = pnand %p632_p5, %p629_p3 }
  0x1c   : > { %637 = shalt.err (!%p634_p7)
}
  0x1d   : > { %s638_s15 = scalar_lea.vmem %s836_s28, 1024  ;;  %p646_p2 = scmp.lt.s32.totalorder %s836_s28, %s836_s28 }
  0x1e   : > { %p639_p9 = scmp.ne.s32.totalorder %s836_s28, %s638_s15  ;;  %p647_p6 = scmp.lt.s32.totalorder %s638_s15, %s638_s15 }
  0x20   : > { %p641_p10 = pnand %p639_p9, %p627_p13  ;;  %p648_p4 = por %p647_p6, %p646_p2 }
  0x22   : > { %p642_p1 = pneg %p641_p10 }
  0x24   : > { %p649_p8 = pnand %p648_p4, %p642_p1 }
  0x26   : > { %652 = shalt.err (!%p649_p8)
}
  0x27   : > { %s756_s16 = smov 64   ;;  %s757_s17 = smov 4  }
  0x28   : > { %563 = dma.hbm_to_vmem [thread:$0]  (!%p843_p11), %s1002_s1, 1024, %s836_s28, [#allocation6], %s756_s16, %s756_s16, %s757_s17  }
  0x29   : > { %p27_p2 = scmp.eq.s32.totalorder %s26_s7, 0  ;;  %p36_p1 = scmp.ne.s32.totalorder %s749_s20, %s745_s19 }
  0x2a   : > { %p37_p4 = scmp.eq.s32.totalorder %s753_s21, 0  ;;  %p573_p6 = scmp.lt.s32.totalorder %s753_s21, 2 }
  0x2b   : > { %s879_s8 = scalar_select %p27_p2, %s749_s20, %s29_s6  }
  0x2c   : > { %p38_p8 = por %p37_p4, %p36_p1  ;;  %p1014_p10 = scmp.eq.s32.totalorder %s813_s22, 1 }
  0x2d   : > { %s198_s10 = sand.u32 1, %s749_s20   ;;  %s503_s11 = sshll.u32 %s753_s21, 6 }
  0x2e   : > { %p883_p12 = por %p1014_p10, %p36_p1  ;;  %s502_s12 = sshll.u32 %s198_s10, 2 }
  0x2f   : > { %s892_s14 = scalar_lea.hbm %s1001_s0, %s503_s11  ;;  %s202_s28 = scalar_lea.vmem [#allocation2], %s502_s12 }
  0x30   : > { %s209_s6 = sshll.u32 %s202_s28, 4  ;;  %p894_p11 = pnand %p573_p6, %p38_p8  ;;  %s898_s6 = int_to_ptr.vmem [resolvable:$true] %s209_s6 }
  0x31   : > { %s199_s15 = scalar_lea.sflag [#allocation3], %s198_s10  ;;  %s653_s16 = scalar_lea.hbm %s892_s14, 64 }
  0x32   : > { %p654_p13 = scmp.ne.s32.totalorder %s892_s14, %s653_s16  ;;  %p655_p0 = pneg %p894_p11 }
  0x33   : > { %s658_s27 = scalar_lea.hbm %s1001_s0, 128  ;;  %p659_p7 = scmp.lt.u32.totalorder %s892_s14, %s1001_s0 }
  0x34   : > { %p656_p3 = pnand %p655_p0, %p654_p13  ;;  %p660_p9 = scmp.lt.u32.totalorder %s658_s27, %s653_s16 }
  0x35   : > { %p662_p1 = scmp.lt.u32.totalorder %s653_s16, %s892_s14 }
  0x36   : > { %p657_p5 = pneg %p656_p3  ;;  %p661_p2 = por %p660_p9, %p659_p7 }
  0x38   : > { %p663_p4 = por %p662_p1, %p661_p2 }
  0x3a   : > { %p664_p6 = pnand %p663_p4, %p657_p5 }
  0x3c   : > { %667 = shalt.err (!%p664_p6)
}
  0x3d   : > { %s668_s10 = scalar_lea.vmem %s898_s6, 64  ;;  %s758_s29 = smov [#allocation2]  }
  0x3e   : > { %p669_p8 = scmp.ne.s32.totalorder %s898_s6, %s668_s10  ;;  %s673_s13 = sshll.u32 %s758_s29, 4  ;;  %s674_s13 = int_to_ptr.vmem [resolvable:$false] %s673_s13 }
  0x3f   : > { %s675_s28 = scalar_lea.vmem %s674_s13, 128  ;;  %p676_p3 = scmp.lt.s32.totalorder %s898_s6, %s674_s13 }
  0x40   : > { %p671_p10 = pnand %p669_p8, %p655_p0  ;;  %p677_p7 = scmp.lt.s32.totalorder %s675_s28, %s668_s10 }
  0x42   : > { %p672_p13 = pneg %p671_p10  ;;  %p678_p9 = por %p677_p7, %p676_p3 }
  0x44   : > { %p679_p2 = pnand %p678_p9, %p672_p13 }
  0x46   : > { %682 = shalt.err (!%p679_p2)
}
  0x47   : > { %567 = dma.hbm_to_vmem [thread:$0]  (!%p894_p11), %s892_s14, 64, %s898_s6, %s199_s15  }
  0x48   : > { %p1017_p5 = scmp.ne.s32.totalorder %s1012_s26, 0 }
  0x49   : > { %s928_s16 = sand.u32 (!%p1017_p5), 1, %s745_s19   ;;  %p1018_p0 = scmp.ne.s32.totalorder (!%p1017_p5), %s1010_s24, 0 }
  0x4a   : > { %218 = sbr.rel (%p1017_p5) target bundleno = 534 (0x216), region = 40  ;;  %s505_s17 = sshll.u32 (!%p1017_p5), %s928_s16, 2 }
  0x4b   : > { %s221_s23 = scalar_lea.sflag (!%p1017_p5), [#allocation3], %s928_s16  ;;  %s932_s27 = scalar_lea.vmem (!%p1017_p5), [#allocation2], %s505_s17 }
  0x51   : > { %728 = dma.done.wait (%p1018_p0), %s221_s23, 64  }
  0x52   : > { %730 = vsyncadd (%p1018_p0), %s221_s23, 4294967232  ;;  %p1019_p11 = scmp.eq.s32.totalorder %s813_s22, 0 }
  0x54   : > { %732 = dma.done.wait (%p1019_p11), [#allocation6], 1024   ;;  %p1020_p1 = pmov %p1019_p11 }
  0x55   : > { %v759_v0 = vmov 0.0   ;;  %vm760_vm0 = vmmov 0   ;;  %v613_v1 = vld [vmem:[#allocation5] sm:$0xff]   ;;  %v614_v2 = vld [vmem:[#allocation5 + $0x8] sm:$0xff]   ;;  %v615_v3 = vld [vmem:[#allocation5 + $0x10] sm:$0xff]   ;;  %s507_s14 = sshll.u32 %s928_s16, 3 }
  0x56   : > { %734 = vsyncadd (%p1020_p1), [#allocation6], 4294966272  ;;  %532 = vmatprep.subr.bf16.mxu0 %v759_v0  ;;  %548 = vmatprep.mubr.msk.bf16.mxu0 %vm760_vm0, %v759_v0  ;;  %v616_v4 = vld [vmem:[#allocation5 + $0x18] sm:$0xff]   ;;  %v617_v5 = vld [vmem:[#allocation5 + $0x20] sm:$0xff]   ;;  %s520_s12 = sshll.u32 %s813_s22, 7  ;;  %s254_s10 = scalar_lea.vmem [#allocation7], %s507_s14 }
  0x57   : > { %533 = vmatpush3.bf16.msra.mxu0 %v613_v1  ;;  %v618_v6 = vld [vmem:[#allocation5 + $0x28] sm:$0xff]   ;;  %v619_v7 = vld [vmem:[#allocation5 + $0x30] sm:$0xff]   ;;  %v620_v8 = vld [vmem:[#allocation5 + $0x38] sm:$0xff]   ;;  %s418_s29 = sshll.u32 %s254_s10, 4  ;;  %s957_s17 = scalar_lea.hbm %s1006_s5, %s520_s12  ;;  %s959_s29 = int_to_ptr.vmem [resolvable:$true] %s418_s29 }
  0x58   : > { %534 = vmatprep.subr.bf16.mxu0 %v759_v0  ;;  %v256_v9 = vld [vmem:[%s932_s27] sm:$0xf]  ;;  %s405_s23 = scalar_lea.sflag [#allocation4], %s928_s16  ;;  %s683_s27 = scalar_lea.vmem %s959_s29, 128 }
  0x59   : > { %v508_v10 = vld [vmem:[%s1003_s2] ss:$0 sm:$0xff]  ;;  %p684_p4 = scmp.ne.s32.totalorder %s959_s29, %s683_s27  ;;  %s761_s22 = smov [#allocation7]  }
  0x5a   : > { %v517_v32 = vld [vmem:[%s1004_s3] ss:$0 sm:$0xff]  ;;  %s687_s24 = sshll.u32 %s761_s22, 4  ;;  %s688_s24 = int_to_ptr.vmem [resolvable:$false] %s687_s24 }
  0x5b   : > { %535 = vmatpush3.bf16.msra.mxu0 %v614_v2  ;;  %v518_v34 = vld [vmem:[%s1005_s4] ss:$0 sm:$0xff]  ;;  %p685_p6 = pnand %p684_p4, %p883_p12  ;;  %s689_s26 = scalar_lea.vmem %s688_s24, 256 }
  0x5c   : > { %536 = vmatprep.subr.bf16.mxu0 %v759_v0  ;;  %p690_p10 = scmp.lt.s32.totalorder %s959_s29, %s688_s24  ;;  %p691_p13 = scmp.lt.s32.totalorder %s689_s26, %s683_s27 }
  0x5d   : > { %p686_p8 = pneg %p685_p6 }
  0x5e   : > { %p692_p3 = por %p691_p13, %p690_p10 }
  0x5f   : > { %537 = vmatpush3.bf16.msra.mxu0 %v615_v3 }
  0x60   : > { %538 = vmatprep.subr.bf16.mxu0 %v759_v0  ;;  %p693_p7 = pnand %p692_p3, %p686_p8 }
  0x63   : > { %539 = vmatpush3.bf16.msra.mxu0 %v616_v4 }
  0x64   : > { %540 = vmatprep.subr.bf16.mxu0 %v759_v0 }
  0x67   : > { %541 = vmatpush3.bf16.msra.mxu0 %v617_v5 }
  0x68   : > { %542 = vmatprep.subr.bf16.mxu0 %v759_v0 }
  0x6b   : > { %543 = vmatpush3.bf16.msra.mxu0 %v618_v6 }
  0x6c   : > { %544 = vmatprep.subr.bf16.mxu0 %v759_v0 }
  0x6f   : > { %545 = vmatpush3.bf16.msra.mxu0 %v619_v7 }
  0x70   : > { %546 = vmatprep.subr.bf16.mxu0 %v759_v0 }
  0x73   : > { %547 = vmatpush3.bf16.msra.mxu0 %v620_v8 }
  0x76   : > { %549 = vmatmul.mubr.bf16.vlgmr.msra.gmra.mrb[0].mxu0 %v256_v9 }
 0x149   : > { %v362_v11 = vpop.f32.mrb[0].mxu0 }
 0x14a   : > { %v363_v12 = vadd.f32 %v508_v10, %v362_v11  ;;  %v550_v13 = vpop.f32.mrb[1].mxu0 }
 0x14b   : > { %v365_v14 = vpop.f32.mrb[2].mxu0 }
 0x14c   : > { %v369_v15 = vmul.f32 0.70710677, %v363_v12  ;;  %v551_v16 = vpop.f32.mrb[3].mxu0  ;;  %v368_v18 = vmul.f32 0.5, %v363_v12 }
 0x14e   : > { %621 = verf.f32 %v369_v15 }
 0x158   : > { %v622_v17 = vpop.eup %621 }
 0x159   : > { %v371_v19 = vadd.f32 1.0, %v622_v17 }
 0x15b   : > { %v372_v20 = vmul.f32 %v371_v19, %v368_v18 }
 0x15d   : > { %373 = vadd.xlane.f32.xlu0 %v372_v20  ;;  %v375_v21 = vmul.f32 %v372_v20, %v372_v20 }
 0x161   : > { %376 = vadd.xlane.f32.xlu0 %v375_v21 }
 0x1ea   : > { %v374_v22 = vpop.xlane.xlu0 %373 }
 0x1eb   : > { %v378_v23 = vmul.f32 0.03125, %v374_v22 }
 0x1ed   : > { %v380_v25 = vmul.f32 %v378_v23, %v378_v23  ;;  %v383_v30 = vsub.f32 %v372_v20, %v378_v23 }
 0x1ee   : > { %v377_v24 = vpop.xlane.xlu0 %376 }
 0x1ef   : > { %v379_v26 = vmul.f32 0.03125, %v377_v24 }
 0x1f1   : > { %v381_v27 = vsub.f32 %v379_v26, %v380_v25 }
 0x1f3   : > { %v382_v28 = vmax.f32 %v381_v27, 0.0 }
 0x1f5   : > { %v384_v29 = vadd.f32 1e-12, %v382_v28 }
 0x1f7   : > { %623 = vrsqrt.f32 %v384_v29 }
 0x201   : > { %v624_v31 = vpop.eup %623 }
 0x202   : > { %v386_v33 = vmul.f32 %v624_v31, %v383_v30 }
 0x204   : > { %v394_v35 = vmul.f32 %v517_v32, %v386_v33 }
 0x206   : > { %v402_v36 = vadd.f32 %v518_v34, %v394_v35 }
 0x208   : > { %403 = vst [vmem:[%s254_s10] sm:$0xff] %v402_v36 }
 0x209   : > { %696 = shalt.err (!%p693_p7)
}
 0x20a   : > { %s697_s16 = scalar_lea.hbm %s957_s17, 128  ;;  %s701_s7 = scalar_lea.hbm %s1006_s5, 256 }
 0x20b   : > { %p698_p9 = scmp.ne.s32.totalorder %s957_s17, %s697_s16  ;;  %p702_p0 = scmp.lt.u32.totalorder %s957_s17, %s1006_s5 }
 0x20c   : > { %p703_p11 = scmp.lt.u32.totalorder %s701_s7, %s697_s16  ;;  %p705_p4 = scmp.lt.u32.totalorder %s697_s16, %s957_s17 }
 0x20d   : > { %p699_p2 = pnand %p698_p9, %p883_p12 }
 0x20e   : > { %p704_p1 = por %p703_p11, %p702_p0 }
 0x20f   : > { %p700_p5 = pneg %p699_p2 }
 0x210   : > { %p706_p6 = por %p705_p4, %p704_p1 }
 0x212   : > { %p707_p8 = pnand %p706_p6, %p700_p5 }
 0x214   : > { %710 = shalt.err (!%p707_p8)
}
 0x215   : > { %558 = dma.vmem_to_hbm [thread:$0]  (%p883_p12), %s959_s29, 128, %s957_s17, %s405_s23  }
 0x216 PF: > { %s430_s12 = sand.u32 1, %s741_s18   ;;  %p1021_p10 = scmp.ne.s32.totalorder %s1011_s25, 0 }
 0x217   : > { %p1022_p13 = scmp.ge.s32.totalorder %s753_s21, 2  ;;  %s431_s10 = scalar_lea.sflag [#allocation4], %s430_s12 }
 0x219   : > { %p569_p3 = pnand %p1022_p13, %p1021_p10 }
 0x21b   : > { %736 = dma.done.wait (!%p569_p3), %s431_s10, 128  }
 0x21c   : > { %738 = vsyncadd (!%p569_p3), %s431_s10, 4294967168  ;;  %p19_p7 = scmp.ge.s32.totalorder %s848_s30, 4   ;;  %s1023_s18 = smov %s745_s19 }
 0x21d   : > { %s1024_s19 = smov %s749_s20  ;;  %s1025_s20 = smov %s879_s8 }
 0x21e   : > { %s1026_s21 = smov %s848_s30  ;;  %21 = sbr.rel (!%p19_p7) target bundleno = 6 (0x6), region = 89 }
 0x225   :  { %436 = vsyncpa [#allocation3], 1 }
 0x226   :  { %438 = vsyncpa [#allocation3 + $0x1], 1 }
 0x227   :  { %439 = vsyncpa [#allocation6], 1 }
 0x228   :  { %440 = vsyncpa [#allocation4], 1 }
 0x229   :  { %442 = vsyncpa [#allocation4 + $0x1], 1 }

// kernel: tpu_custom_call.1
= control target key start
LH: loop header
LB: loop body
LE: loop exit
PB: predicated region body
PF: predicated region fallthrough
CT: control target
= control target key end

     0   :  { %10 = vsyncpa [#allocation3], 0  ;;  %s1001_s0 = inlined_call_operand.hbm [shape: bf16[16,128], index: 0, kind: input, shape index: {}]   ;;  %s1002_s1 = inlined_call_operand.hbm [shape: bf16[128,128], index: 1, kind: input, shape index: {}]   ;;  %s1003_s2 = inlined_call_operand.vmem [shape: f32[1,128], index: 2, kind: input, shape index: {}]   ;;  %s1004_s3 = inlined_call_operand.vmem [shape: f32[1,128], index: 3, kind: input, shape index: {}]   ;;  %s1005_s4 = inlined_call_operand.vmem [shape: f32[1,128], index: 4, kind: input, shape index: {}]   ;;  %s1006_s5 = inlined_call_operand.hbm [shape: f32[16,128], index: 5, kind: output, shape index: {}]  }
   0x1   :  { %12 = vsyncpa [#allocation3 + $0x1], 0 }
   0x2   :  { %13 = vsyncpa [#allocation6], 0 }
   0x3   :  { %14 = vsyncpa [#allocation4], 0 }
   0x4   :  { %16 = vsyncpa [#allocation4 + $0x1], 0  ;;  %s792_s18 = smov 0   ;;  %s794_s19 = smov 0  }
   0x5   :  { %s796_s20 = smov 0   ;;  %s798_s21 = smov 0  }
   0x6 LB: > { %s813_s22 = sadd.s32 4294967295, %s753_s21   ;;  %s498_s23 = sadd.s32 4294967294, %s753_s21   ;;  %s753_s21 = sphi %s798_s21, %s1026_s21   ;;  %s749_s20 = sphi %s796_s20, %s1025_s20   ;;  %s745_s19 = sphi %s794_s19, %s1024_s19   ;;  %s741_s18 = sphi %s792_s18, %s1023_s18  }
   0x7   : > { %p42_p0 = scmp.ne.s32.totalorder %s745_s19, %s741_s18  ;;  %p1007_p1 = scmp.eq.s32.totalorder %s813_s22, 0 }
   0x8   : > { %p156_p3 = scmp.eq.s32.totalorder %s498_s23, 1  ;;  %p499_p5 = scmp.ge.s32.totalorder %s753_s21, 1 }
   0x9   : > { %p822_p4 = por %p1007_p1, %p42_p0  ;;  %p163_p7 = scmp.lt.s32.totalorder %s753_s21, 3 }
   0xa   : > { %p827_p6 = por %p156_p3, %p42_p0  ;;  %s755_s27 = smov [#allocation5]  }
   0xb   : > { %s1010_s24 = scalar_select %p822_p4, 1, 0 }
   0xc   : > { %s1011_s25 = scalar_select %p827_p6, 1, 0 }
   0xd   : > { %p832_p8 = pnand %p499_p5, %p163_p7  ;;  %s175_s28 = sshll.u32 %s755_s27, 4  ;;  %s836_s28 = int_to_ptr.vmem [resolvable:$true] %s175_s28 }
   0xe   : > { %s848_s30 = sadd.s32 1, %s753_s21   ;;  %s29_s6 = sadd.s32 1, %s749_s20 }
   0xf   : > { %s1012_s26 = scalar_select %p832_p8, 1, 0 }
  0x10   : > { %p560_p9 = pneg %p832_p8  ;;  %s26_s7 = ssub.s32 %s753_s21, %s848_s30 }
  0x11   : > { %s625_s10 = scalar_lea.hbm %s1002_s1, 1024 }
  0x12   : > { %p843_p11 = pnand %p560_p9, %p1007_p1  ;;  %p626_p12 = scmp.ne.s32.totalorder %s1002_s1, %s625_s10 }
  0x13   : > { %p632_p5 = scmp.lt.u32.totalorder %s625_s10, %s1002_s1 }
  0x14   : > { %p627_p13 = pneg %p843_p11 }
  0x16   : > { %p628_p0 = pnand %p627_p13, %p626_p12 }
  0x18   : > { %p629_p3 = pneg %p628_p0 }
  0x1a   : > { %p634_p7 = pnand %p632_p5, %p629_p3 }
  0x1c   : > { %637 = shalt.err (!%p634_p7)
}
  0x1d   : > { %s638_s15 = scalar_lea.vmem %s836_s28, 1024  ;;  %p646_p2 = scmp.lt.s32.totalorder %s836_s28, %s836_s28 }
  0x1e   : > { %p639_p9 = scmp.ne.s32.totalorder %s836_s28, %s638_s15  ;;  %p647_p6 = scmp.lt.s32.totalorder %s638_s15, %s638_s15 }
  0x20   : > { %p641_p10 = pnand %p639_p9, %p627_p13  ;;  %p648_p4 = por %p647_p6, %p646_p2 }
  0x22   : > { %p642_p1 = pneg %p641_p10 }
  0x24   : > { %p649_p8 = pnand %p648_p4, %p642_p1 }
  0x26   : > { %652 = shalt.err (!%p649_p8)
}
  0x27   : > { %s756_s16 = smov 64   ;;  %s757_s17 = smov 4  }
  0x28   : > { %563 = dma.hbm_to_vmem [thread:$0]  (!%p843_p11), %s1002_s1, 1024, %s836_s28, [#allocation6], %s756_s16, %s756_s16, %s757_s17  }
  0x29   : > { %p27_p2 = scmp.eq.s32.totalorder %s26_s7, 0  ;;  %p36_p1 = scmp.ne.s32.totalorder %s749_s20, %s745_s19 }
  0x2a   : > { %p37_p4 = scmp.eq.s32.totalorder %s753_s21, 0  ;;  %p573_p6 = scmp.lt.s32.totalorder %s753_s21, 2 }
  0x2b   : > { %s879_s8 = scalar_select %p27_p2, %s749_s20, %s29_s6  }
  0x2c   : > { %p38_p8 = por %p37_p4, %p36_p1  ;;  %p1014_p10 = scmp.eq.s32.totalorder %s813_s22, 1 }
  0x2d   : > { %s198_s10 = sand.u32 1, %s749_s20   ;;  %s503_s11 = sshll.u32 %s753_s21, 6 }
  0x2e   : > { %p883_p12 = por %p1014_p10, %p36_p1  ;;  %s502_s12 = sshll.u32 %s198_s10, 2 }
  0x2f   : > { %s892_s14 = scalar_lea.hbm %s1001_s0, %s503_s11  ;;  %s202_s28 = scalar_lea.vmem [#allocation2], %s502_s12 }
  0x30   : > { %s209_s6 = sshll.u32 %s202_s28, 4  ;;  %p894_p11 = pnand %p573_p6, %p38_p8  ;;  %s898_s6 = int_to_ptr.vmem [resolvable:$true] %s209_s6 }
  0x31   : > { %s199_s15 = scalar_lea.sflag [#allocation3], %s198_s10  ;;  %s653_s16 = scalar_lea.hbm %s892_s14, 64 }
  0x32   : > { %p654_p13 = scmp.ne.s32.totalorder %s892_s14, %s653_s16  ;;  %p655_p0 = pneg %p894_p11 }
  0x33   : > { %s658_s27 = scalar_lea.hbm %s1001_s0, 128  ;;  %p659_p7 = scmp.lt.u32.totalorder %s892_s14, %s1001_s0 }
  0x34   : > { %p656_p3 = pnand %p655_p0, %p654_p13  ;;  %p660_p9 = scmp.lt.u32.totalorder %s658_s27, %s653_s16 }
  0x35   : > { %p662_p1 = scmp.lt.u32.totalorder %s653_s16, %s892_s14 }
  0x36   : > { %p657_p5 = pneg %p656_p3  ;;  %p661_p2 = por %p660_p9, %p659_p7 }
  0x38   : > { %p663_p4 = por %p662_p1, %p661_p2 }
  0x3a   : > { %p664_p6 = pnand %p663_p4, %p657_p5 }
  0x3c   : > { %667 = shalt.err (!%p664_p6)
}
  0x3d   : > { %s668_s10 = scalar_lea.vmem %s898_s6, 64  ;;  %s758_s29 = smov [#allocation2]  }
  0x3e   : > { %p669_p8 = scmp.ne.s32.totalorder %s898_s6, %s668_s10  ;;  %s673_s13 = sshll.u32 %s758_s29, 4  ;;  %s674_s13 = int_to_ptr.vmem [resolvable:$false] %s673_s13 }
  0x3f   : > { %s675_s28 = scalar_lea.vmem %s674_s13, 128  ;;  %p676_p3 = scmp.lt.s32.totalorder %s898_s6, %s674_s13 }
  0x40   : > { %p671_p10 = pnand %p669_p8, %p655_p0  ;;  %p677_p7 = scmp.lt.s32.totalorder %s675_s28, %s668_s10 }
  0x42   : > { %p672_p13 = pneg %p671_p10  ;;  %p678_p9 = por %p677_p7, %p676_p3 }
  0x44   : > { %p679_p2 = pnand %p678_p9, %p672_p13 }
  0x46   : > { %682 = shalt.err (!%p679_p2)
}
  0x47   : > { %567 = dma.hbm_to_vmem [thread:$0]  (!%p894_p11), %s892_s14, 64, %s898_s6, %s199_s15  }
  0x48   : > { %p1017_p5 = scmp.ne.s32.totalorder %s1012_s26, 0 }
  0x49   : > { %s928_s16 = sand.u32 (!%p1017_p5), 1, %s745_s19   ;;  %p1018_p0 = scmp.ne.s32.totalorder (!%p1017_p5), %s1010_s24, 0 }
  0x4a   : > { %218 = sbr.rel (%p1017_p5) target bundleno = 534 (0x216), region = 40  ;;  %s505_s17 = sshll.u32 (!%p1017_p5), %s928_s16, 2 }
  0x4b   : > { %s221_s23 = scalar_lea.sflag (!%p1017_p5), [#allocation3], %s928_s16  ;;  %s932_s27 = scalar_lea.vmem (!%p1017_p5), [#allocation2], %s505_s17 }
  0x51   : > { %728 = dma.done.wait (%p1018_p0), %s221_s23, 64  }
  0x52   : > { %730 = vsyncadd (%p1018_p0), %s221_s23, 4294967232  ;;  %p1019_p11 = scmp.eq.s32.totalorder %s813_s22, 0 }
  0x54   : > { %732 = dma.done.wait (%p1019_p11), [#allocation6], 1024   ;;  %p1020_p1 = pmov %p1019_p11 }
  0x55   : > { %v759_v0 = vmov 0.0   ;;  %vm760_vm0 = vmmov 0   ;;  %v613_v1 = vld [vmem:[#allocation5] sm:$0xff]   ;;  %v614_v2 = vld [vmem:[#allocation5 + $0x8] sm:$0xff]   ;;  %v615_v3 = vld [vmem:[#allocation5 + $0x10] sm:$0xff]   ;;  %s507_s14 = sshll.u32 %s928_s16, 3 }
  0x56   : > { %734 = vsyncadd (%p1020_p1), [#allocation6], 4294966272  ;;  %532 = vmatprep.subr.bf16.mxu0 %v759_v0  ;;  %548 = vmatprep.mubr.msk.bf16.mxu0 %vm760_vm0, %v759_v0  ;;  %v616_v4 = vld [vmem:[#allocation5 + $0x18] sm:$0xff]   ;;  %v617_v5 = vld [vmem:[#allocation5 + $0x20] sm:$0xff]   ;;  %s520_s12 = sshll.u32 %s813_s22, 7  ;;  %s254_s10 = scalar_lea.vmem [#allocation7], %s507_s14 }
  0x57   : > { %533 = vmatpush3.bf16.msra.mxu0 %v613_v1  ;;  %v618_v6 = vld [vmem:[#allocation5 + $0x28] sm:$0xff]   ;;  %v619_v7 = vld [vmem:[#allocation5 + $0x30] sm:$0xff]   ;;  %v620_v8 = vld [vmem:[#allocation5 + $0x38] sm:$0xff]   ;;  %s418_s29 = sshll.u32 %s254_s10, 4  ;;  %s957_s17 = scalar_lea.hbm %s1006_s5, %s520_s12  ;;  %s959_s29 = int_to_ptr.vmem [resolvable:$true] %s418_s29 }
  0x58   : > { %534 = vmatprep.subr.bf16.mxu0 %v759_v0  ;;  %v256_v9 = vld [vmem:[%s932_s27] sm:$0xf]  ;;  %s405_s23 = scalar_lea.sflag [#allocation4], %s928_s16  ;;  %s683_s27 = scalar_lea.vmem %s959_s29, 128 }
  0x59   : > { %v508_v10 = vld [vmem:[%s1003_s2] ss:$0 sm:$0xff]  ;;  %p684_p4 = scmp.ne.s32.totalorder %s959_s29, %s683_s27  ;;  %s761_s22 = smov [#allocation7]  }
  0x5a   : > { %v517_v32 = vld [vmem:[%s1004_s3] ss:$0 sm:$0xff]  ;;  %s687_s24 = sshll.u32 %s761_s22, 4  ;;  %s688_s24 = int_to_ptr.vmem [resolvable:$false] %s687_s24 }
  0x5b   : > { %535 = vmatpush3.bf16.msra.mxu0 %v614_v2  ;;  %v518_v34 = vld [vmem:[%s1005_s4] ss:$0 sm:$0xff]  ;;  %p685_p6 = pnand %p684_p4, %p883_p12  ;;  %s689_s26 = scalar_lea.vmem %s688_s24, 256 }
  0x5c   : > { %536 = vmatprep.subr.bf16.mxu0 %v759_v0  ;;  %p690_p10 = scmp.lt.s32.totalorder %s959_s29, %s688_s24  ;;  %p691_p13 = scmp.lt.s32.totalorder %s689_s26, %s683_s27 }
  0x5d   : > { %p686_p8 = pneg %p685_p6 }
  0x5e   : > { %p692_p3 = por %p691_p13, %p690_p10 }
  0x5f   : > { %537 = vmatpush3.bf16.msra.mxu0 %v615_v3 }
  0x60   : > { %538 = vmatprep.subr.bf16.mxu0 %v759_v0  ;;  %p693_p7 = pnand %p692_p3, %p686_p8 }
  0x63   : > { %539 = vmatpush3.bf16.msra.mxu0 %v616_v4 }
  0x64   : > { %540 = vmatprep.subr.bf16.mxu0 %v759_v0 }
  0x67   : > { %541 = vmatpush3.bf16.msra.mxu0 %v617_v5 }
  0x68   : > { %542 = vmatprep.subr.bf16.mxu0 %v759_v0 }
  0x6b   : > { %543 = vmatpush3.bf16.msra.mxu0 %v618_v6 }
  0x6c   : > { %544 = vmatprep.subr.bf16.mxu0 %v759_v0 }
  0x6f   : > { %545 = vmatpush3.bf16.msra.mxu0 %v619_v7 }
  0x70   : > { %546 = vmatprep.subr.bf16.mxu0 %v759_v0 }
  0x73   : > { %547 = vmatpush3.bf16.msra.mxu0 %v620_v8 }
  0x76   : > { %549 = vmatmul.mubr.bf16.vlgmr.msra.gmra.mrb[0].mxu0 %v256_v9 }
 0x149   : > { %v362_v11 = vpop.f32.mrb[0].mxu0 }
 0x14a   : > { %v363_v12 = vadd.f32 %v508_v10, %v362_v11  ;;  %v550_v13 = vpop.f32.mrb[1].mxu0 }
 0x14b   : > { %v365_v14 = vpop.f32.mrb[2].mxu0 }
 0x14c   : > { %v369_v15 = vmul.f32 0.70710677, %v363_v12  ;;  %v551_v16 = vpop.f32.mrb[3].mxu0  ;;  %v368_v18 = vmul.f32 0.5, %v363_v12 }
 0x14e   : > { %621 = verf.f32 %v369_v15 }
 0x158   : > { %v622_v17 = vpop.eup %621 }
 0x159   : > { %v371_v19 = vadd.f32 1.0, %v622_v17 }
 0x15b   : > { %v372_v20 = vmul.f32 %v371_v19, %v368_v18 }
 0x15d   : > { %373 = vadd.xlane.f32.xlu0 %v372_v20  ;;  %v375_v21 = vmul.f32 %v372_v20, %v372_v20 }
 0x161   : > { %376 = vadd.xlane.f32.xlu0 %v375_v21 }
 0x1ea   : > { %v374_v22 = vpop.xlane.xlu0 %373 }
 0x1eb   : > { %v378_v23 = vmul.f32 0.03125, %v374_v22 }
 0x1ed   : > { %v380_v25 = vmul.f32 %v378_v23, %v378_v23  ;;  %v383_v30 = vsub.f32 %v372_v20, %v378_v23 }
 0x1ee   : > { %v377_v24 = vpop.xlane.xlu0 %376 }
 0x1ef   : > { %v379_v26 = vmul.f32 0.03125, %v377_v24 }
 0x1f1   : > { %v381_v27 = vsub.f32 %v379_v26, %v380_v25 }
 0x1f3   : > { %v382_v28 = vmax.f32 %v381_v27, 0.0 }
 0x1f5   : > { %v384_v29 = vadd.f32 1e-12, %v382_v28 }
 0x1f7   : > { %623 = vrsqrt.f32 %v384_v29 }
 0x201   : > { %v624_v31 = vpop.eup %623 }
 0x202   : > { %v386_v33 = vmul.f32 %v624_v31, %v383_v30 }
 0x204   : > { %v394_v35 = vmul.f32 %v517_v32, %v386_v33 }
 0x206   : > { %v402_v36 = vadd.f32 %v518_v34, %v394_v35 }
 0x208   : > { %403 = vst [vmem:[%s254_s10] sm:$0xff] %v402_v36 }
 0x209   : > { %696 = shalt.err (!%p693_p7)
}
 0x20a   : > { %s697_s16 = scalar_lea.hbm %s957_s17, 128  ;;  %s701_s7 = scalar_lea.hbm %s1006_s5, 256 }
 0x20b   : > { %p698_p9 = scmp.ne.s32.totalorder %s957_s17, %s697_s16  ;;  %p702_p0 = scmp.lt.u32.totalorder %s957_s17, %s1006_s5 }
 0x20c   : > { %p703_p11 = scmp.lt.u32.totalorder %s701_s7, %s697_s16  ;;  %p705_p4 = scmp.lt.u32.totalorder %s697_s16, %s957_s17 }
 0x20d   : > { %p699_p2 = pnand %p698_p9, %p883_p12 }
 0x20e   : > { %p704_p1 = por %p703_p11, %p702_p0 }
 0x20f   : > { %p700_p5 = pneg %p699_p2 }
 0x210   : > { %p706_p6 = por %p705_p4, %p704_p1 }
 0x212   : > { %p707_p8 = pnand %p706_p6, %p700_p5 }
 0x214   : > { %710 = shalt.err (!%p707_p8)
}
 0x215   : > { %558 = dma.vmem_to_hbm [thread:$0]  (%p883_p12), %s959_s29, 128, %s957_s17, %s405_s23  }
 0x216 PF: > { %s430_s12 = sand.u32 1, %s741_s18   ;;  %p1021_p10 = scmp.ne.s32.totalorder %s1011_s25, 0 }
 0x217   : > { %p1022_p13 = scmp.ge.s32.totalorder %s753_s21, 2  ;;  %s431_s10 = scalar_lea.sflag [#allocation4], %s430_s12 }
 0x219   : > { %p569_p3 = pnand %p1022_p13, %p1021_p10 }
 0x21b   : > { %736 = dma.done.wait (!%p569_p3), %s431_s10, 128  }
 0x21c   : > { %738 = vsyncadd (!%p569_p3), %s431_s10, 4294967168  ;;  %p19_p7 = scmp.ge.s32.totalorder %s848_s30, 4   ;;  %s1023_s18 = smov %s745_s19 }
 0x21d   : > { %s1024_s19 = smov %s749_s20  ;;  %s1025_s20 = smov %s879_s8 }
 0x21e   : > { %s1026_s21 = smov %s848_s30  ;;  %21 = sbr.rel (!%p19_p7) target bundleno = 6 (0x6), region = 89 }
 0x225   :  { %436 = vsyncpa [#allocation3], 1 }
 0x226   :  { %438 = vsyncpa [#allocation3 + $0x1], 1 }
 0x227   :  { %439 = vsyncpa [#allocation6], 1 }
 0x228   :  { %440 = vsyncpa [#allocation4], 1 }
 0x229   :  { %442 = vsyncpa [#allocation4 + $0x1], 1 }

</bundles_post_ra>
